<compile_context>
chip_gen: v5e
topology: v5e:2x2
jax: 0.10.0
libtpu: 0.0.40
codegen_flags: <defaults>
</compile_context>

<pallas_src>
import numpy as np
import jax
import jax.numpy as jnp
from jax.experimental import pallas as pl
from jax.experimental.pallas import tpu as pltpu


# ----------------------------------------------------------------------------
# Deterministic "parameters": the blur filter buffer of the Upsample module.
# ----------------------------------------------------------------------------
def get_filter_np(filt_size=4):
    taps = {
        1: [1.0],
        2: [1.0, 1.0],
        3: [1.0, 2.0, 1.0],
        4: [1.0, 3.0, 3.0, 1.0],
        5: [1.0, 4.0, 6.0, 4.0, 1.0],
        6: [1.0, 5.0, 10.0, 10.0, 5.0, 1.0],
        7: [1.0, 6.0, 15.0, 20.0, 15.0, 6.0, 1.0],
    }[filt_size]
    a = np.array(taps, dtype=np.float64)
    f = a[:, None] * a[None, :]
    return (f / f.sum()).astype(np.float32)


def _separable_taps(filt_size=4, stride=2):
    # Module's 2-D filter == outer(a,a)/sum(outer(a,a)) * stride**2 == outer(g, g)
    # with g = a / sum(a) * stride.  For filt_size=4, stride=2: [0.25, 0.75, 0.75, 0.25].
    assert filt_size == 4 and stride == 2
    a = np.array([1.0, 3.0, 3.0, 1.0], dtype=np.float64)
    return a / a.sum() * stride


def _col_upsample_matrix(W, g):
    # Constant (W, 2W) matrix folding: 1-pixel replication pad along W, the 1-D
    # stride-2 transposed conv (taps g) and the even/odd column interleave:
    #   col[:, 2w]   = g3 * x[:, max(w-1,0)] + g1 * x[:, w]
    #   col[:, 2w+1] = g2 * x[:, w]          + g0 * x[:, min(w+1,W-1)]
    M = np.zeros((W, 2 * W), dtype=np.float32)
    for w in range(W):
        M[max(w - 1, 0), 2 * w] += g[3]
        M[w, 2 * w] += g[1]
        M[w, 2 * w + 1] += g[2]
        M[min(w + 1, W - 1), 2 * w + 1] += g[0]
    return M


def _row_upsample_matrix(H, g):
    # Same 1-D op along H, expressed as a left-multiply (2H, H) matrix; this
    # also performs the even/odd ROW interleave so the kernel's output is
    # already in the final (2H, 2W) layout:
    #   y[2h,   :] = g3 * c[max(h-1,0), :] + g1 * c[h, :]
    #   y[2h+1, :] = g2 * c[h, :]          + g0 * c[min(h+1,H-1), :]
    R = np.zeros((2 * H, H), dtype=np.float32)
    for h in range(H):
        R[2 * h, max(h - 1, 0)] += g[3]
        R[2 * h, h] += g[1]
        R[2 * h + 1, h] += g[2]
        R[2 * h + 1, min(h + 1, H - 1)] += g[0]
    return R


# ----------------------------------------------------------------------------
# Fused Pallas kernel: per plane, out = R @ (x @ M), both matmuls on the MXU.
# ----------------------------------------------------------------------------
def _upsample_kernel(m_ref, r_ref, x_ref, out_ref):
    # m_ref  : (W, 2W)       constant column-upsample matrix (f32), VMEM-resident
    # r_ref  : (2H, H)       constant row-upsample matrix (f32), VMEM-resident
    # x_ref  : (TB, H, W)    TB flattened N*C planes, unpadded
    # out_ref: (TB, 2H, 2W)  final row/col-interleaved result
    TB = x_ref.shape[0]
    m = m_ref[...]
    r = r_ref[...]
    for p in range(TB):  # small static unroll over planes in this tile
        xp = x_ref[p].astype(jnp.float32)                       # (H, W)
        c = jnp.dot(xp, m,
                    precision=jax.lax.Precision.HIGHEST,
                    preferred_element_type=jnp.float32)          # (H, 2W)
        y = jnp.dot(r, c,
                    precision=jax.lax.Precision.HIGHEST,
                    preferred_element_type=jnp.float32)          # (2H, 2W)
        out_ref[p] = y.astype(out_ref.dtype)


# ----------------------------------------------------------------------------
# Wrapper.
# ----------------------------------------------------------------------------
def upsample(x, pad_type="repl", filt_size=4, stride=2,
             tile_budget_bytes=2 * 1024 * 1024):
    # Module defaults only; other configs would change the phase decomposition.
    assert filt_size == 4 and stride == 2 and pad_type in ("repl", "replicate")
    N, C, H, W = x.shape
    B = N * C

    g = _separable_taps(filt_size, stride)
    M = jnp.asarray(_col_upsample_matrix(W, g))
    R = jnp.asarray(_row_upsample_matrix(H, g))
    xb = x.reshape(B, H, W)   # leading-dim merge only -> free

    # Planes per grid step: largest divisor of B whose (input + output) tile
    # stays under the budget, preferring a grid of length >= 2 so the
    # "parallel" axis can be sharded over both v7x TensorCores.
    itemsize = jnp.dtype(x.dtype).itemsize
    per_plane = (H * W + (2 * H) * (2 * W)) * itemsize
    divisors = [d for d in range(1, B + 1) if B % d == 0]
    fits = [d for d in divisors if d * per_plane <= tile_budget_bytes]
    pref = [d for d in fits if B // d >= 2]
    tb = max(pref) if pref else (max(fits) if fits else 1)
    # TODO(synk): for very large planes (per_plane > budget), add an H-tiling
    # grid axis (with the matching block of R rows) instead of shipping whole
    # planes per step.

    grid = (B // tb,)
    const_bytes = int(M.size + R.size) * 4
    vmem_need = 4 * tb * per_plane + 2 * const_bytes + (2 << 20)
    vmem_limit = int(min(32 * 1024 * 1024, max(16 * 1024 * 1024, vmem_need)))

    out = pl.pallas_call(
        _upsample_kernel,
        out_shape=jax.ShapeDtypeStruct((B, 2 * H, 2 * W), x.dtype),
        grid_spec=pltpu.PrefetchScalarGridSpec(
            num_scalar_prefetch=0,
            grid=grid,
            in_specs=[
                pl.BlockSpec((W, 2 * W), lambda b: (0, 0)),        # column matrix (resident)
                pl.BlockSpec((2 * H, H), lambda b: (0, 0)),        # row matrix (resident)
                pl.BlockSpec((tb, H, W), lambda b: (b, 0, 0)),     # input planes
            ],
            out_specs=pl.BlockSpec((tb, 2 * H, 2 * W), lambda b: (b, 0, 0)),
        ),
        compiler_params=pltpu.CompilerParams(
            dimension_semantics=("parallel",),
            vmem_limit_bytes=vmem_limit,
        ),
    )(M, R, xb)

    # (B, 2H, 2W) -> (N, C, 2H, 2W): only splits leading (untiled) dims, so this
    # reshape is a true zero-cost layout reinterpretation (no relayout copy).
    return out.reshape(N, C, 2 * H, 2 * W)


# ----------------------------------------------------------------------------
# Brute-force numpy reference with exact F.conv_transpose2d semantics.
# ----------------------------------------------------------------------------
def ref_upsample_numpy(x, filt_size=4, stride=2):
    Wk = get_filter_np(filt_size) * (stride ** 2)
    pad_size = (filt_size - 1) // 2
    p = 1 + pad_size
    N, C, H, Wd = x.shape
    xp = np.pad(x, ((0, 0), (0, 0), (1, 1), (1, 1)), mode="edge")
    Hp, Wp = H + 2, Wd + 2
    OH = (Hp - 1) * stride - 2 * p + filt_size
    OW = (Wp - 1) * stride - 2 * p + filt_size
    y = np.zeros((N, C, OH, OW), dtype=np.float64)
    for ih in range(Hp):
        for iw in range(Wp):
            for kh in range(filt_size):
                for kw in range(filt_size):
                    oh = ih * stride - p + kh
                    ow = iw * stride - p + kw
                    if 0 <= oh < OH and 0 <= ow < OW:
                        y[:, :, oh, ow] += xp[:, :, ih, iw] * Wk[kh, kw]
    y = y[:, :, 1:, 1:]
    if filt_size % 2 == 0:           # filt_odd == False for filt_size = 4
        y = y[:, :, :-1, :-1]
    return y.astype(np.float32)


if __name__ == "__main__":
    key = jax.random.PRNGKey(0)
    N, C, H, W = 2, 4, 16, 16
    x = jax.random.normal(key, (N, C, H, W), dtype=jnp.float32)

    y = upsample(x)
    y = jax.block_until_ready(y)
    assert y.shape == (N, C, 2 * H, 2 * W), y.shape

    y_ref = ref_upsample_numpy(np.asarray(x))
    np.testing.assert_allclose(np.asarray(y), y_ref, rtol=1e-5, atol=1e-5)
    print("KERNEL_OK")
</pallas_src>

<mosaic_0001>
module attributes {stable_mosaic.version = 11 : i64} {
  func.func @_upsample_kernel(%arg0: i32, %arg1: memref<16x32xf32, #tpu.memory_space<vmem>>, %arg2: memref<32x16xf32, #tpu.memory_space<vmem>>, %arg3: memref<4x16x16xf32, #tpu.memory_space<vmem>>, %arg4: memref<4x32x32xf32, #tpu.memory_space<vmem>>) attributes {dimension_semantics = [#tpu.dimension_semantics<parallel>], iteration_bounds = array<i64: 2>, scalar_prefetch = 0 : i64, scratch_operands = 0 : i64, tpu.core_type = #tpu.core_type<tc>, window_params = [{pipeline_mode = #tpu.pipeline_mode<synchronous>, transform_indices = @transform_0, window_bounds = array<i64: 16, 32>}, {pipeline_mode = #tpu.pipeline_mode<synchronous>, transform_indices = @transform_1, window_bounds = array<i64: 32, 16>}, {transform_indices = @transform_2, window_bounds = array<i64: 4, 16, 16>}, {transform_indices = @transform_3, window_bounds = array<i64: 4, 32, 32>}]} {
    %c0 = arith.constant 0 : index
    %c0_0 = arith.constant 0 : index
    %0 = vector.load %arg1[%c0, %c0_0] : memref<16x32xf32, #tpu.memory_space<vmem>>, vector<16x32xf32>
    %c0_1 = arith.constant 0 : index
    %c0_2 = arith.constant 0 : index
    %1 = vector.load %arg2[%c0_1, %c0_2] : memref<32x16xf32, #tpu.memory_space<vmem>>, vector<32x16xf32>
    %c0_3 = arith.constant 0 : index
    %c0_4 = arith.constant 0 : index
    %c0_5 = arith.constant 0 : index
    %2 = vector.load %arg3[%c0_3, %c0_4, %c0_5] : memref<4x16x16xf32, #tpu.memory_space<vmem>>, vector<1x16x16xf32>
    %3 = vector.shape_cast %2 : vector<1x16x16xf32> to vector<16x16xf32>
    %cst = arith.constant dense<0.000000e+00> : vector<16x32xf32>
    %4 = tpu.matmul %3, %0, %cst {dimension_numbers = #tpu.dot_dimension_numbers<[1], [0], [0], [1], [0, 0, 1, 1], [], []>, precision = #tpu.contract_precision<fp32>} : vector<16x16xf32>, vector<16x32xf32>, vector<16x32xf32> -> vector<16x32xf32>
    %cst_6 = arith.constant dense<0.000000e+00> : vector<32x32xf32>
    %5 = tpu.matmul %1, %4, %cst_6 {dimension_numbers = #tpu.dot_dimension_numbers<[1], [0], [0], [1], [0, 0, 1, 1], [], []>, precision = #tpu.contract_precision<fp32>} : vector<32x16xf32>, vector<16x32xf32>, vector<32x32xf32> -> vector<32x32xf32>
    %c0_7 = arith.constant 0 : index
    %c0_8 = arith.constant 0 : index
    %c0_9 = arith.constant 0 : index
    %6 = vector.load %arg4[%c0_7, %c0_8, %c0_9] : memref<4x32x32xf32, #tpu.memory_space<vmem>>, vector<1x32x32xf32>
    %7 = vector.shape_cast %6 : vector<1x32x32xf32> to vector<32x32xf32>
    %8 = vector.shape_cast %5 : vector<32x32xf32> to vector<1x32x32xf32>
    tpu.vector_store %arg4[%c0_7, %c0_8, %c0_9], %8 {strides = array<i32>} : memref<4x32x32xf32, #tpu.memory_space<vmem>>, vector<1x32x32xf32>,
    %c1 = arith.constant 1 : index
    %c0_10 = arith.constant 0 : index
    %c0_11 = arith.constant 0 : index
    %9 = vector.load %arg3[%c1, %c0_10, %c0_11] : memref<4x16x16xf32, #tpu.memory_space<vmem>>, vector<1x16x16xf32>
    %10 = vector.shape_cast %9 : vector<1x16x16xf32> to vector<16x16xf32>
    %cst_12 = arith.constant dense<0.000000e+00> : vector<16x32xf32>
    %11 = tpu.matmul %10, %0, %cst_12 {dimension_numbers = #tpu.dot_dimension_numbers<[1], [0], [0], [1], [0, 0, 1, 1], [], []>, precision = #tpu.contract_precision<fp32>} : vector<16x16xf32>, vector<16x32xf32>, vector<16x32xf32> -> vector<16x32xf32>
    %cst_13 = arith.constant dense<0.000000e+00> : vector<32x32xf32>
    %12 = tpu.matmul %1, %11, %cst_13 {dimension_numbers = #tpu.dot_dimension_numbers<[1], [0], [0], [1], [0, 0, 1, 1], [], []>, precision = #tpu.contract_precision<fp32>} : vector<32x16xf32>, vector<16x32xf32>, vector<32x32xf32> -> vector<32x32xf32>
    %c1_14 = arith.constant 1 : index
    %c0_15 = arith.constant 0 : index
    %c0_16 = arith.constant 0 : index
    %13 = vector.load %arg4[%c1_14, %c0_15, %c0_16] : memref<4x32x32xf32, #tpu.memory_space<vmem>>, vector<1x32x32xf32>
    %14 = vector.shape_cast %13 : vector<1x32x32xf32> to vector<32x32xf32>
    %15 = vector.shape_cast %12 : vector<32x32xf32> to vector<1x32x32xf32>
    tpu.vector_store %arg4[%c1_14, %c0_15, %c0_16], %15 {strides = array<i32>} : memref<4x32x32xf32, #tpu.memory_space<vmem>>, vector<1x32x32xf32>,
    %c2 = arith.constant 2 : index
    %c0_17 = arith.constant 0 : index
    %c0_18 = arith.constant 0 : index
    %16 = vector.load %arg3[%c2, %c0_17, %c0_18] : memref<4x16x16xf32, #tpu.memory_space<vmem>>, vector<1x16x16xf32>
    %17 = vector.shape_cast %16 : vector<1x16x16xf32> to vector<16x16xf32>
    %cst_19 = arith.constant dense<0.000000e+00> : vector<16x32xf32>
    %18 = tpu.matmul %17, %0, %cst_19 {dimension_numbers = #tpu.dot_dimension_numbers<[1], [0], [0], [1], [0, 0, 1, 1], [], []>, precision = #tpu.contract_precision<fp32>} : vector<16x16xf32>, vector<16x32xf32>, vector<16x32xf32> -> vector<16x32xf32>
    %cst_20 = arith.constant dense<0.000000e+00> : vector<32x32xf32>
    %19 = tpu.matmul %1, %18, %cst_20 {dimension_numbers = #tpu.dot_dimension_numbers<[1], [0], [0], [1], [0, 0, 1, 1], [], []>, precision = #tpu.contract_precision<fp32>} : vector<32x16xf32>, vector<16x32xf32>, vector<32x32xf32> -> vector<32x32xf32>
    %c2_21 = arith.constant 2 : index
    %c0_22 = arith.constant 0 : index
    %c0_23 = arith.constant 0 : index
    %20 = vector.load %arg4[%c2_21, %c0_22, %c0_23] : memref<4x32x32xf32, #tpu.memory_space<vmem>>, vector<1x32x32xf32>
    %21 = vector.shape_cast %20 : vector<1x32x32xf32> to vector<32x32xf32>
    %22 = vector.shape_cast %19 : vector<32x32xf32> to vector<1x32x32xf32>
    tpu.vector_store %arg4[%c2_21, %c0_22, %c0_23], %22 {strides = array<i32>} : memref<4x32x32xf32, #tpu.memory_space<vmem>>, vector<1x32x32xf32>,
    %c3 = arith.constant 3 : index
    %c0_24 = arith.constant 0 : index
    %c0_25 = arith.constant 0 : index
    %23 = vector.load %arg3[%c3, %c0_24, %c0_25] : memref<4x16x16xf32, #tpu.memory_space<vmem>>, vector<1x16x16xf32>
    %24 = vector.shape_cast %23 : vector<1x16x16xf32> to vector<16x16xf32>
    %cst_26 = arith.constant dense<0.000000e+00> : vector<16x32xf32>
    %25 = tpu.matmul %24, %0, %cst_26 {dimension_numbers = #tpu.dot_dimension_numbers<[1], [0], [0], [1], [0, 0, 1, 1], [], []>, precision = #tpu.contract_precision<fp32>} : vector<16x16xf32>, vector<16x32xf32>, vector<16x32xf32> -> vector<16x32xf32>
    %cst_27 = arith.constant dense<0.000000e+00> : vector<32x32xf32>
    %26 = tpu.matmul %1, %25, %cst_27 {dimension_numbers = #tpu.dot_dimension_numbers<[1], [0], [0], [1], [0, 0, 1, 1], [], []>, precision = #tpu.contract_precision<fp32>} : vector<32x16xf32>, vector<16x32xf32>, vector<32x32xf32> -> vector<32x32xf32>
    %c3_28 = arith.constant 3 : index
    %c0_29 = arith.constant 0 : index
    %c0_30 = arith.constant 0 : index
    %27 = vector.load %arg4[%c3_28, %c0_29, %c0_30] : memref<4x32x32xf32, #tpu.memory_space<vmem>>, vector<1x32x32xf32>
    %28 = vector.shape_cast %27 : vector<1x32x32xf32> to vector<32x32xf32>
    %29 = vector.shape_cast %26 : vector<32x32xf32> to vector<1x32x32xf32>
    tpu.vector_store %arg4[%c3_28, %c0_29, %c0_30], %29 {strides = array<i32>} : memref<4x32x32xf32, #tpu.memory_space<vmem>>, vector<1x32x32xf32>,
    return
  }
  func.func @transform_0(%arg0: i32) -> (i32, i32) {
    %c0_i32 = arith.constant 0 : i32
    %c0_i32_0 = arith.constant 0 : i32
    %c0_i32_1 = arith.constant 0 : i32
    return %c0_i32, %c0_i32_0 : i32, i32
  }
  func.func @transform_1(%arg0: i32) -> (i32, i32) {
    %c0_i32 = arith.constant 0 : i32
    %c0_i32_0 = arith.constant 0 : i32
    %c0_i32_1 = arith.constant 0 : i32
    return %c0_i32, %c0_i32_0 : i32, i32
  }
  func.func @transform_2(%arg0: i32) -> (i32, i32, i32) {
    %c0_i32 = arith.constant 0 : i32
    %c0_i32_0 = arith.constant 0 : i32
    %c0_i32_1 = arith.constant 0 : i32
    return %arg0, %c0_i32, %c0_i32_0 : i32, i32, i32
  }
  func.func @transform_3(%arg0: i32) -> (i32, i32, i32) {
    %c0_i32 = arith.constant 0 : i32
    %c0_i32_0 = arith.constant 0 : i32
    %c0_i32_1 = arith.constant 0 : i32
    return %arg0, %c0_i32, %c0_i32_0 : i32, i32, i32
  }
}

</mosaic_0001>

<bundles_post_ra>
// kernel: tpu_custom_call.1
= control target key start
LH: loop header
LB: loop body
LE: loop exit
PB: predicated region body
PF: predicated region fallthrough
CT: control target
= control target key end

     0   :  { %8 = vsyncpa [#allocation3], 0  ;;  %s2755_s0 = inlined_call_operand.vmem [shape: f32[16,32], index: 0, kind: input, shape index: {}]   ;;  %s2756_s1 = inlined_call_operand.vmem [shape: f32[32,16], index: 1, kind: input, shape index: {}]   ;;  %s2757_s2 = inlined_call_operand.hbm [shape: f32[8,16,16], index: 2, kind: input, shape index: {}]   ;;  %s2758_s3 = inlined_call_operand.hbm [shape: f32[8,32,32], index: 3, kind: output, shape index: {}]  }
   0x1   :  { %10 = vsyncpa [#allocation3 + $0x1], 0 }
   0x2   :  { %11 = vsyncpa [#allocation4], 0 }
   0x3   :  { %13 = vsyncpa [#allocation4 + $0x1], 0  ;;  %s2336_s12 = smov 0   ;;  %s2338_s13 = smov 0  }
   0x4   :  { %s2340_s14 = smov 0   ;;  %s2342_s15 = smov 0  }
   0x5 LB: > { %s2357_s16 = sadd.s32 4294967295, %s2310_s15   ;;  %s2126_s17 = sadd.s32 4294967294, %s2310_s15   ;;  %s2310_s15 = sphi %s2342_s15, %s2768_s15   ;;  %s2306_s14 = sphi %s2340_s14, %s2767_s14   ;;  %s2302_s13 = sphi %s2338_s13, %s2766_s13   ;;  %s2298_s12 = sphi %s2336_s12, %s2765_s12  }
   0x6   : > { %s2361_s18 = sadd.s32 1, %s2310_s15   ;;  %s68_s19 = sadd.s32 1, %s2306_s14 }
   0x7   : > { %s65_s20 = ssub.s32 %s2310_s15, %s2361_s18  ;;  %p75_p0 = scmp.ne.s32.totalorder %s2306_s14, %s2302_s13 }
   0x8   : > { %p66_p1 = scmp.eq.s32.totalorder %s65_s20, 0  ;;  %p76_p2 = scmp.eq.s32.totalorder %s2310_s15, 0 }
   0x9   : > { %p81_p3 = scmp.ne.s32.totalorder %s2302_s13, %s2298_s12  ;;  %p82_p4 = scmp.eq.s32.totalorder %s2357_s16, 0 }
   0xa   : > { %s2373_s21 = scalar_select %p66_p1, %s2306_s14, %s68_s19  }
   0xb   : > { %p2375_p5 = por %p76_p2, %p75_p0  ;;  %p2379_p6 = por %p82_p4, %p81_p3 }
   0xc   : > { %p105_p7 = scmp.eq.s32.totalorder %s2357_s16, 1  ;;  %p111_p8 = scmp.eq.s32.totalorder %s2126_s17, 1 }
   0xd   : > { %p2176_p10 = scmp.lt.s32.totalorder %s2310_s15, 2  ;;  %s137_s26 = sand.u32 1, %s2306_s14  }
   0xe   : > { %p2386_p11 = por %p105_p7, %p75_p0  ;;  %p2390_p12 = por %p111_p8, %p81_p3 }
   0xf   : > { %s2161_s27 = sshll.u32 %s2310_s15, 6  ;;  %s2129_s28 = sshll.u32 %s137_s26, 6 }
  0x10   : > { %s147_s4 = scalar_lea.hbm %s2757_s2, %s2161_s27  ;;  %s141_s6 = scalar_lea.vmem [#allocation2], %s2129_s28 }
  0x11   : > { %s148_s5 = sshll.u32 %s147_s4, 4  ;;  %s150_s7 = sshll.u32 %s141_s6, 4  ;;  %s149_s5 = int_to_ptr.hbm [resolvable:$true] %s148_s5  ;;  %s151_s7 = int_to_ptr.vmem [resolvable:$true] %s150_s7 }
  0x12   : > { %p2401_p13 = pnand %p2176_p10, %p2375_p5  ;;  %p2133_p0 = scmp.ge.s32.totalorder %s2310_s15, 1 }
  0x13   : > { %p158_p1 = scmp.lt.s32.totalorder %s2310_s15, 3  ;;  %s138_s9 = scalar_lea.sflag [#allocation3], %s137_s26 }
  0x14   : > { %s2214_s10 = sshra.s32 %s149_s5, 4  ;;  %p2218_p3 = pneg %p2401_p13  ;;  %s2215_s10 = int_to_ptr.hbm [resolvable:$true] %s2214_s10 }
  0x15   : > { %s2216_s11 = scalar_lea.hbm %s2215_s10, 64  ;;  %s2221_s20 = scalar_lea.hbm %s2757_s2, 128 }
  0x16   : > { %p2217_p2 = scmp.ne.s32.totalorder %s2215_s10, %s2216_s11  ;;  %p2222_p5 = scmp.lt.s32.totalorder %s2215_s10, %s2757_s2 }
  0x17   : > { %p2223_p8 = scmp.lt.s32.totalorder %s2221_s20, %s2216_s11 }
  0x18   : > { %p2219_p4 = pnand %p2218_p3, %p2217_p2 }
  0x19   : > { %p2224_p10 = por %p2223_p8, %p2222_p5 }
  0x1a   : > { %p2220_p7 = pneg %p2219_p4 }
  0x1c   : > { %p2225_p9 = pnand %p2224_p10, %p2220_p7 }
  0x1e   : > { %2228 = shalt.err (!%p2225_p9)
}
  0x1f   : > { %s2312_s26 = smov 128   ;;  %s2313_s28 = smov 8  }
  0x20   : > { %2171 = dma.hbm_to_vmem [thread:$0]  (!%p2401_p13), %s149_s5, 1024, %s151_s7, %s138_s9, %s2312_s26, %s2312_s26, %s2313_s28  }
  0x21   : > { %p159_p2 = pnand %p2133_p0, %p158_p1 }
  0x22   : > { %s2422_s29 = sand.u32 (!%p159_p2), 1, %s2302_s13  }
  0x23   : > { %162 = sbr.rel (%p159_p2) target bundleno = 1073 (0x431), region = 32  ;;  %s2134_s30 = sshll.u32 (!%p159_p2), %s2422_s29, 6 }
  0x24   : > { %s165_s4 = scalar_lea.sflag (!%p159_p2), [#allocation3], %s2422_s29  ;;  %s2426_s6 = scalar_lea.vmem (!%p159_p2), [#allocation2], %s2134_s30 }
  0x28   : > { %2289 = dma.done.wait (%p2379_p6), %s165_s4, 1024  }
  0x29   : > { %2291 = vsyncadd (%p2379_p6), %s165_s4, 4294966272  ;;  %vm202_vm0 = vcmask 130048   ;;  %v195_v0 = vld [vmem:[%s2755_s0 + $0x8] sm:$0xff]  ;;  %v194_v1 = vld [vmem:[%s2755_s0] sm:$0xff]  ;;  %s2135_s26 = sshll.u32 %s2422_s29, 7  ;;  %vm663_vm1 = vcmask 261120  }
  0x2a   : > { %v200_v2 = vld [vmem:[%s2426_s6] sm:$0xff]  ;;  %v2439_v3 = vand.u32 4294901760, %v195_v0  ;;  %v2441_v4 = vand.u32 4294901760, %v194_v1  ;;  %v201_v6 = vld [vmem:[%s2426_s6 + $0x8] sm:$0xff]  ;;  %v198_v55 = vld [vmem:[%s2756_s1 + $0x10] sm:$0xff]  ;;  %s2583_s28 = scalar_lea.vmem [#allocation5], %s2135_s26 }
  0x2b   : > { %v204_v5 = vsel %vm202_vm0, %v200_v2, 0  ;;  %v207_v8 = vsel %vm202_vm0, %v201_v6, 0  ;;  %v196_v30 = vld [vmem:[%s2756_s1] sm:$0xff]  ;;  %v197_v40 = vld [vmem:[%s2756_s1 + $0x8] sm:$0xff]  ;;  %v406_v61 = vsel %vm202_vm0, %v198_v55, 0  ;;  %v199_v6 = vld [vmem:[%s2756_s1 + $0x18] sm:$0xff] }
  0x2c   : > { %v227_v7 = vand.u32 4294901760, %v204_v5  ;;  %224 = vmatpush.msra.mxu2 %v2439_v3  ;;  %v2448_v9 = vsub.f32 %v195_v0, %v2439_v3  ;;  %v2451_v10 = vsub.f32 %v194_v1, %v2441_v4  ;;  %v235_v11 = vand.u32 4294901760, %v207_v8  ;;  %387 = vmatpush.msra.mxu1 %v2439_v3  ;;  %s2163_s30 = sshll.u32 %s2357_s16, 7  ;;  %s2050_s7 = sshll.u32 %s2583_s28, 4  ;;  %s2051_s7 = int_to_ptr.vmem [resolvable:$true] %s2050_s7 }
  0x2d   : > { %v400_v32 = vsel %vm202_vm0, %v196_v30, 0  ;;  %v403_v45 = vsel %vm202_vm0, %v197_v40, 0  ;;  %v2510_v1 = vand.u32 4294901760, %v406_v61  ;;  %s2049_s5 = scalar_lea.hbm %s2758_s3, %s2163_s30  ;;  %s2037_s16 = scalar_lea.sflag [#allocation4], %s2422_s29 }
  0x2e   : > { %v228_v12 = vsub.f32 %v204_v5, %v227_v7  ;;  %226 = vmatpush.msra.mxu2 %v2441_v4  ;;  %v2456_v13 = vand.u32 4294901760, %v2448_v9  ;;  %v2459_v14 = vand.u32 4294901760, %v2451_v10  ;;  %v236_v15 = vsub.f32 %v207_v8, %v235_v11  ;;  %389 = vmatpush.msra.mxu1 %v2441_v4  ;;  %s2052_s8 = sshll.u32 %s2049_s5, 4  ;;  %s2264_s17 = scalar_lea.hbm %s2758_s3, 256  ;;  %s2053_s8 = int_to_ptr.hbm [resolvable:$true] %s2052_s8 }
  0x2f   : > { %391 = vmatmul.f32.vlgmr.msra.gmra.mxu1 %v227_v7  ;;  %v2482_v38 = vand.u32 4294901760, %v400_v32  ;;  %v2494_v51 = vand.u32 4294901760, %v403_v45  ;;  %s2258_s9 = sshra.s32 %s2053_s8, 4  ;;  %s2259_s9 = int_to_ptr.hbm [resolvable:$true] %s2258_s9 }
  0x30   : > { %v229_v16 = vand.u32 4294901760, %v228_v12  ;;  %295 = vmatpush.msrb.mxu2 %v2448_v9  ;;  %v261_v17 = vsub.f32 %v2448_v9, %v2456_v13  ;;  %v267_v18 = vsub.f32 %v2451_v10, %v2459_v14  ;;  %358 = vmatpush.msra.mxu0 %v2456_v13  ;;  %v237_v20 = vand.u32 4294901760, %v236_v15  ;;  %s2260_s23 = scalar_lea.hbm %s2259_s9, 128  ;;  %p2265_p0 = scmp.lt.s32.totalorder %s2259_s9, %s2758_s3 }
  0x31   : > { %v2488_v42 = vsub.f32 %v400_v32, %v2482_v38  ;;  %v2502_v58 = vsub.f32 %v403_v45, %v2494_v51  ;;  %v2137_v32 = vld [vmem:[%s2426_s6 + $0x18] sm:$0xff]  ;;  %p2261_p6 = scmp.ne.s32.totalorder %s2259_s9, %s2260_s23  ;;  %p2266_p1 = scmp.lt.s32.totalorder %s2264_s17, %s2260_s23 }
  0x32   : > { %v230_v19 = vsub.f32 %v228_v12, %v229_v16  ;;  %298 = vmatpush.msrb.mxu2 %v2451_v10  ;;  %v2469_v21 = vand.u32 4294901760, %v261_v17  ;;  %v2471_v22 = vand.u32 4294901760, %v267_v18  ;;  %362 = vmatpush.msra.mxu0 %v2459_v14  ;;  %v238_v24 = vsub.f32 %v236_v15, %v237_v20 }
  0x33   : > { %364 = vmatmul.f32.vlgmr.msra.gmra.mxu0 %v227_v7  ;;  %v2492_v50 = vand.u32 4294901760, %v2488_v42  ;;  %v2508_v0 = vand.u32 4294901760, %v2502_v58  ;;  %p2262_p9 = pnand %p2261_p6, %p2386_p11  ;;  %p2267_p3 = por %p2266_p1, %p2265_p0 }
  0x34   : > { %v231_v23 = vand.u32 4294901760, %v230_v19  ;;  %263 = vmatpush.msra.mxu3 %v2469_v21  ;;  %v239_v25 = vand.u32 4294901760, %v238_v24 }
  0x35   : > { %v432_v57 = vsub.f32 %v2488_v42, %v2492_v50  ;;  %v440_v8 = vsub.f32 %v2502_v58, %v2508_v0  ;;  %p2263_p13 = pneg %p2262_p9 }
  0x36   : > { %232 = vmatmul.f32.vlgmr.msra.gmra.mxu2 %v231_v23  ;;  %269 = vmatpush.msra.mxu3 %v2471_v22 }
  0x37   : > { %271 = vmatmul.f32.vlgmr.msra.gmra.mxu3 %v227_v7  ;;  %395 = vmatmul.f32.gmra.mxu1 %v235_v11  ;;  %v2505_v63 = vand.u32 4294901760, %v432_v57  ;;  %v2525_v18 = vand.u32 4294901760, %v440_v8  ;;  %p2268_p4 = pnand %p2267_p3, %p2263_p13 }
  0x38   : > { %325 = vmatpush.msrb.mxu3 %v2439_v3 }
  0x3a   : > { %327 = vmatpush.msrb.mxu3 %v2441_v4 }
  0x3b   : > { %368 = vmatmul.f32.gmra.mxu0 %v235_v11 }
  0x3e   : > { %240 = vmatmul.f32.gmra.mxu2 %v239_v25 }
  0x3f   : > { %275 = vmatmul.f32.gmra.mxu3 %v235_v11  ;;  %v2519_v11 = vsub.f32 %v406_v61, %v2510_v1 }
  0x41   : > { %v2528_v19 = vand.u32 4294901760, %v2519_v11 }
  0x43   : > { %v448_v24 = vsub.f32 %v2519_v11, %v2528_v19 }
  0x46   : > { %301 = vmatmul.f32.vlgmr.msrb.gmra.mxu2 %v228_v12 }
  0x47   : > { %331 = vmatmul.f32.vlgmr.msrb.gmra.mxu3 %v229_v16  ;;  %v409_v16 = vsel %vm202_vm0, %v199_v6, 0 }
  0x4e   : > { %306 = vmatmul.f32.gmra.mxu2 %v236_v15 }
  0x4f   : > { %337 = vmatmul.f32.gmra.mxu3 %v237_v20  ;;  %v2530_v20 = vand.u32 4294901760, %v409_v16 }
  0x51   : > { %v2543_v25 = vsub.f32 %v409_v16, %v2530_v20 }
  0xac   : > { %v392_v37 = vpop.f32.mrf.mxu1 }
  0xb0   : > { %v365_v34 = vpop.f32.mrf.mxu0 }
  0xb4   : > { %v396_v54 = vpop.f32.mrf.mxu1 }
  0xb8   : > { %v369_v49 = vpop.f32.mrf.mxu0 }
  0xb9   : > { %v233_v26 = vpop.f32.mrf.mxu2 }
  0xba   : > { %v272_v27 = vpop.f32.mrf.mxu3 }
  0xbb   : > { %v273_v31 = vadd.f32 %v272_v27, %v233_v26  ;;  %v2136_v26 = vld [vmem:[%s2426_s6 + $0x10] sm:$0xff] }
  0xbc   : > { %v672_v27 = vsel %vm202_vm0, %v2136_v26, 0 }
  0xbd   : > { %v695_v30 = vand.u32 4294901760, %v672_v27 }
  0xc1   : > { %v241_v28 = vpop.f32.mrf.mxu2 }
  0xc2   : > { %v276_v29 = vpop.f32.mrf.mxu3 }
  0xc3   : > { %v277_v43 = vadd.f32 %v276_v29, %v241_v28  ;;  %v2551_v28 = vand.u32 4294901760, %v448_v24  ;;  %v2554_v29 = vand.u32 4294901760, %v2543_v25 }
  0xc9   : > { %v302_v33 = vpop.f32.mrf.mxu2 }
  0xca   : > { %v303_v35 = vadd.f32 %v302_v33, %v273_v31  ;;  %v332_v36 = vpop.f32.mrf.mxu3  ;;  %v456_v31 = vsub.f32 %v2543_v25, %v2554_v29  ;;  %v696_v33 = vsub.f32 %v672_v27, %v695_v30 }
  0xcc   : > { %v333_v39 = vadd.f32 %v332_v36, %v303_v35  ;;  %v2567_v35 = vand.u32 4294901760, %v456_v31  ;;  %v697_v36 = vand.u32 4294901760, %v696_v33 }
  0xce   : > { %v366_v41 = vadd.f32 %v365_v34, %v333_v39  ;;  %v675_v34 = vsel %vm202_vm0, %v2137_v32, 0  ;;  %v698_v39 = vsub.f32 %v696_v33, %v697_v36 }
  0xd0   : > { %v393_v44 = vadd.f32 %v392_v37, %v366_v41  ;;  %v703_v37 = vand.u32 4294901760, %v675_v34  ;;  %v699_v41 = vand.u32 4294901760, %v698_v39 }
  0xd1   : > { %v307_v46 = vpop.f32.mrf.mxu2 }
  0xd2   : > { %v308_v47 = vadd.f32 %v307_v46, %v277_v43  ;;  %v338_v48 = vpop.f32.mrf.mxu3  ;;  %v427_v52 = vand.u32 4294901760, %v393_v44  ;;  %v704_v40 = vsub.f32 %v675_v34, %v703_v37 }
  0xd4   : > { %v339_v53 = vadd.f32 %v338_v48, %v308_v47  ;;  %v483_v59 = vsub.f32 %v393_v44, %v427_v52  ;;  %v705_v43 = vand.u32 4294901760, %v704_v40 }
  0xd6   : > { %v370_v56 = vadd.f32 %v369_v49, %v339_v53  ;;  %v484_v5 = vand.u32 4294901760, %v483_v59  ;;  %v706_v44 = vsub.f32 %v704_v40, %v705_v43 }
  0xd8   : > { %v397_v60 = vadd.f32 %v396_v54, %v370_v56  ;;  %v485_v15 = vsub.f32 %v483_v59, %v484_v5  ;;  %v707_v45 = vand.u32 4294901760, %v706_v44 }
  0xda   : > { %v425_v62 = vand.u32 4294901760, %v397_v60  ;;  %v486_v23 = vand.u32 4294901760, %v485_v15 }
  0xdc   : > { %v477_v2 = vsub.f32 %v397_v60, %v425_v62  ;;  %426 = vmatpush.msra.mxu2 %v425_v62  ;;  %561 = vmatpush.msrb.mxu1 %v425_v62 }
  0xde   : > { %428 = vmatpush.msra.mxu2 %v427_v52  ;;  %521 = vmatpush.msrb.mxu0 %v477_v2  ;;  %v478_v7 = vand.u32 4294901760, %v477_v2 }
  0xdf   : > { %563 = vmatpush.msrb.mxu1 %v427_v52  ;;  %434 = vmatmul.f32.vlgmr.msra.gmra.mxu2 %v2505_v63 }
  0xe0   : > { %524 = vmatpush.msrb.mxu0 %v483_v59  ;;  %606 = vmatpush.msrb.mxu2 %v478_v7  ;;  %v479_v12 = vsub.f32 %v477_v2, %v478_v7 }
  0xe1   : > { %527 = vmatmul.f32.vlgmr.msrb.gmra.mxu0 %v2488_v42  ;;  %567 = vmatmul.f32.vlgmr.msrb.gmra.mxu1 %v2492_v50 }
  0xe2   : > { %610 = vmatpush.msrb.mxu2 %v484_v5  ;;  %v480_v17 = vand.u32 4294901760, %v479_v12  ;;  %692 = vmatpush.msra.mxu0 %v2439_v3 }
  0xe3   : > { %731 = vmatpush.msra.mxu1 %v2469_v21 }
  0xe4   : > { %826 = vmatpush.msra.mxu2 %v2456_v13  ;;  %481 = vmatpush.msra.mxu3 %v480_v17 }
  0xe5   : > { %694 = vmatpush.msra.mxu0 %v2441_v4  ;;  %737 = vmatpush.msra.mxu1 %v2471_v22 }
  0xe6   : > { %487 = vmatpush.msra.mxu3 %v486_v23  ;;  %830 = vmatpush.msra.mxu2 %v2459_v14 }
  0xe7   : > { %763 = vmatpush.msrb.mxu0 %v2448_v9  ;;  %793 = vmatpush.msrb.mxu1 %v2439_v3 }
  0xe8   : > { %442 = vmatmul.f32.gmra.mxu2 %v2525_v18  ;;  %489 = vmatmul.f32.vlgmr.msra.gmra.mxu3 %v2482_v38 }
  0xe9   : > { %643 = vmatpush.msrb.mxu3 %v425_v62  ;;  %766 = vmatpush.msrb.mxu0 %v2451_v10 }
  0xea   : > { %532 = vmatmul.f32.gmra.mxu0 %v2502_v58  ;;  %573 = vmatmul.f32.gmra.mxu1 %v2508_v0 }
  0xeb   : > { %645 = vmatpush.msrb.mxu3 %v427_v52  ;;  %795 = vmatpush.msrb.mxu1 %v2441_v4 }
  0xed   : > { %855 = vmatpush.msra.mxu3 %v2439_v3 }
  0xef   : > { %857 = vmatpush.msra.mxu3 %v2441_v4 }
  0xf0   : > { %450 = vmatmul.f32.gmra.mxu2 %v2551_v28  ;;  %493 = vmatmul.f32.gmra.mxu3 %v2494_v51 }
  0xf2   : > { %537 = vmatmul.f32.gmra.mxu0 %v2519_v11  ;;  %579 = vmatmul.f32.gmra.mxu1 %v2528_v19 }
  0xf8   : > { %458 = vmatmul.f32.gmra.mxu2 %v2567_v35  ;;  %497 = vmatmul.f32.gmra.mxu3 %v2510_v1 }
  0xfa   : > { %542 = vmatmul.f32.gmra.mxu0 %v2543_v25  ;;  %585 = vmatmul.f32.gmra.mxu1 %v2554_v29 }
 0x100   : > { %501 = vmatmul.f32.gmra.mxu3 %v2530_v20  ;;  %612 = vmatmul.f32.vlgmr.msrb.gmra.mxu2 %v2482_v38 }
 0x102   : > { %700 = vmatmul.f32.vlgmr.msra.gmra.mxu0 %v699_v41  ;;  %739 = vmatmul.f32.vlgmr.msra.gmra.mxu1 %v695_v30 }
 0x108   : > { %616 = vmatmul.f32.gmra.mxu2 %v2494_v51  ;;  %647 = vmatmul.f32.vlgmr.msrb.gmra.mxu3 %v2482_v38 }
 0x10a   : > { %708 = vmatmul.f32.gmra.mxu0 %v707_v45  ;;  %743 = vmatmul.f32.gmra.mxu1 %v703_v37 }
 0x110   : > { %620 = vmatmul.f32.gmra.mxu2 %v2510_v1  ;;  %651 = vmatmul.f32.gmra.mxu3 %v2494_v51 }
 0x112   : > { %769 = vmatmul.f32.vlgmr.msrb.gmra.mxu0 %v696_v33  ;;  %799 = vmatmul.f32.vlgmr.msrb.gmra.mxu1 %v697_v36 }
 0x118   : > { %624 = vmatmul.f32.gmra.mxu2 %v2530_v20  ;;  %655 = vmatmul.f32.gmra.mxu3 %v2510_v1 }
 0x11a   : > { %774 = vmatmul.f32.gmra.mxu0 %v704_v40  ;;  %805 = vmatmul.f32.gmra.mxu1 %v705_v43 }
 0x120   : > { %659 = vmatmul.f32.gmra.mxu3 %v2530_v20  ;;  %832 = vmatmul.f32.vlgmr.msra.gmra.mxu2 %v695_v30 }
 0x128   : > { %836 = vmatmul.f32.gmra.mxu2 %v703_v37  ;;  %859 = vmatmul.f32.vlgmr.msra.gmra.mxu3 %v695_v30 }
 0x130   : > { %863 = vmatmul.f32.gmra.mxu3 %v703_v37 }
 0x15e   : > { %v528_v46 = vpop.f32.mrf.mxu0  ;;  %v568_v48 = vpop.f32.mrf.mxu1 }
 0x162   : > { %v435_v47 = vpop.f32.mrf.mxu2 }
 0x167   : > { %v533_v53 = vpop.f32.mrf.mxu0  ;;  %v574_v54 = vpop.f32.mrf.mxu1 }
 0x16b   : > { %v443_v49 = vpop.f32.mrf.mxu2  ;;  %v490_v52 = vpop.f32.mrf.mxu3 }
 0x16c   : > { %v491_v62 = vadd.f32 %v490_v52, %v435_v47 }
 0x16e   : > { %v529_v7 = vadd.f32 %v528_v46, %v491_v62 }
 0x16f   : > { %v538_v57 = vpop.f32.mrf.mxu0  ;;  %v580_v59 = vpop.f32.mrf.mxu1 }
 0x170   : > { %v569_v15 = vadd.f32 %v568_v48, %v529_v7 }
 0x173   : > { %v451_v55 = vpop.f32.mrf.mxu2  ;;  %v494_v56 = vpop.f32.mrf.mxu3 }
 0x174   : > { %v495_v12 = vadd.f32 %v494_v56, %v443_v49 }
 0x176   : > { %v534_v26 = vadd.f32 %v533_v53, %v495_v12 }
 0x177   : > { %v543_v2 = vpop.f32.mrf.mxu0  ;;  %v586_v8 = vpop.f32.mrf.mxu1 }
 0x178   : > { %v575_v32 = vadd.f32 %v574_v54, %v534_v26 }
 0x17b   : > { %v459_v60 = vpop.f32.mrf.mxu2  ;;  %v498_v61 = vpop.f32.mrf.mxu3 }
 0x17c   : > { %v499_v31 = vadd.f32 %v498_v61, %v451_v55 }
 0x17e   : > { %v539_v37 = vadd.f32 %v538_v57, %v499_v31 }
 0x17f   : > { %v701_v17 = vpop.f32.mrf.mxu0  ;;  %v740_v30 = vpop.f32.mrf.mxu1 }
 0x180   : > { %v581_v43 = vadd.f32 %v580_v59, %v539_v37  ;;  %v741_v53 = vadd.f32 %v740_v30, %v701_v17 }
 0x183   : > { %v502_v5 = vpop.f32.mrf.mxu3  ;;  %v613_v6 = vpop.f32.mrf.mxu2 }
 0x184   : > { %v614_v16 = vadd.f32 %v613_v6, %v569_v15  ;;  %v503_v41 = vadd.f32 %v502_v5, %v459_v60 }
 0x186   : > { %v544_v48 = vadd.f32 %v543_v2, %v503_v41  ;;  %v2142_v41 = vld [vmem:[%s2426_s6 + $0x20] sm:$0xff] }
 0x187   : > { %v709_v40 = vpop.f32.mrf.mxu0  ;;  %v744_v44 = vpop.f32.mrf.mxu1 }
 0x188   : > { %v587_v54 = vadd.f32 %v586_v8, %v544_v48  ;;  %v745_v59 = vadd.f32 %v744_v44, %v709_v40 }
 0x18b   : > { %v617_v23 = vpop.f32.mrf.mxu2  ;;  %v648_v24 = vpop.f32.mrf.mxu3 }
 0x18c   : > { %v649_v27 = vadd.f32 %v648_v24, %v614_v16  ;;  %v618_v33 = vadd.f32 %v617_v23, %v575_v32 }
 0x18e   : > { %664 = vst.msk [vmem:[%s2583_s28] sm:$0xff] %vm663_vm1, %v649_v27 }
 0x18f   : > { %v770_v52 = vpop.f32.mrf.mxu0  ;;  %v800_v56 = vpop.f32.mrf.mxu1 }
 0x190   : > { %v771_v61 = vadd.f32 %v770_v52, %v741_v53 }
 0x192   : > { %v801_v60 = vadd.f32 %v800_v56, %v771_v61 }
 0x193   : > { %v621_v34 = vpop.f32.mrf.mxu2  ;;  %v652_v36 = vpop.f32.mrf.mxu3 }
 0x194   : > { %v653_v39 = vadd.f32 %v652_v36, %v618_v33  ;;  %v622_v45 = vadd.f32 %v621_v34, %v581_v43  ;;  %v1128_v43 = vsel %vm202_vm0, %v2142_v41, 0 }
 0x195   : > { %v1151_v44 = vand.u32 4294901760, %v1128_v43 }
 0x196   : > { %665 = vst.msk [vmem:[%s2583_s28 + $0x8] sm:$0xff] %vm663_vm1, %v653_v39 }
 0x197   : > { %v775_v5 = vpop.f32.mrf.mxu0  ;;  %v806_v16 = vpop.f32.mrf.mxu1 }
 0x198   : > { %v776_v2 = vadd.f32 %v775_v5, %v745_v59 }
 0x19a   : > { %v807_v24 = vadd.f32 %v806_v16, %v776_v2 }
 0x19b   : > { %v625_v46 = vpop.f32.mrf.mxu2  ;;  %v656_v47 = vpop.f32.mrf.mxu3 }
 0x19c   : > { %v657_v49 = vadd.f32 %v656_v47, %v622_v45  ;;  %v626_v55 = vadd.f32 %v625_v46, %v587_v54  ;;  %v2143_v45 = vld [vmem:[%s2426_s6 + $0x28] sm:$0xff]  ;;  %v1152_v46 = vsub.f32 %v1128_v43, %v1151_v44 }
 0x19d   : > { %v1131_v47 = vsel %vm202_vm0, %v2143_v45, 0 }
 0x19e   : > { %666 = vst.msk [vmem:[%s2583_s28 + $0x10] sm:$0xff] %vm663_vm1, %v657_v49  ;;  %v1153_v48 = vand.u32 4294901760, %v1152_v46  ;;  %v1159_v49 = vand.u32 4294901760, %v1131_v47 }
 0x1a0   : > { %v1154_v52 = vsub.f32 %v1152_v46, %v1153_v48  ;;  %v1160_v53 = vsub.f32 %v1131_v47, %v1159_v49 }
 0x1a2   : > { %v1155_v54 = vand.u32 4294901760, %v1154_v52 }
 0x1a3   : > { %v660_v57 = vpop.f32.mrf.mxu3  ;;  %v833_v6 = vpop.f32.mrf.mxu2 }
 0x1a4   : > { %v661_v62 = vadd.f32 %v660_v57, %v626_v55  ;;  %v834_v7 = vadd.f32 %v833_v6, %v801_v60  ;;  %v1161_v55 = vand.u32 4294901760, %v1160_v53 }
 0x1a6   : > { %667 = vst.msk [vmem:[%s2583_s28 + $0x18] sm:$0xff] %vm663_vm1, %v661_v62  ;;  %v1162_v56 = vsub.f32 %v1160_v53, %v1161_v55 }
 0x1a8   : > { %v1163_v57 = vand.u32 4294901760, %v1162_v56 }
 0x1ab   : > { %v860_v12 = vpop.f32.mrf.mxu3  ;;  %v837_v23 = vpop.f32.mrf.mxu2 }
 0x1ac   : > { %v861_v15 = vadd.f32 %v860_v12, %v834_v7  ;;  %v838_v8 = vadd.f32 %v837_v23, %v807_v24 }
 0x1ae   : > { %v883_v17 = vand.u32 4294901760, %v861_v15 }
 0x1b0   : > { %v939_v27 = vsub.f32 %v861_v15, %v883_v17 }
 0x1b2   : > { %v940_v33 = vand.u32 4294901760, %v939_v27 }
 0x1b3   : > { %v864_v26 = vpop.f32.mrf.mxu3 }
 0x1b4   : > { %v865_v30 = vadd.f32 %v864_v26, %v838_v8  ;;  %v941_v37 = vsub.f32 %v939_v27, %v940_v33 }
 0x1b6   : > { %v881_v31 = vand.u32 4294901760, %v865_v30  ;;  %v942_v40 = vand.u32 4294901760, %v941_v37 }
 0x1b8   : > { %v933_v32 = vsub.f32 %v865_v30, %v881_v31  ;;  %882 = vmatpush.msra.mxu0 %v881_v31  ;;  %1017 = vmatpush.msrb.mxu3 %v881_v31 }
 0x1ba   : > { %v934_v34 = vand.u32 4294901760, %v933_v32  ;;  %884 = vmatpush.msra.mxu0 %v883_v17  ;;  %977 = vmatpush.msrb.mxu2 %v933_v32 }
 0x1bb   : > { %1019 = vmatpush.msrb.mxu3 %v883_v17  ;;  %890 = vmatmul.f32.vlgmr.msra.gmra.mxu0 %v2505_v63 }
 0x1bc   : > { %v935_v36 = vsub.f32 %v933_v32, %v934_v34  ;;  %980 = vmatpush.msrb.mxu2 %v939_v27  ;;  %1062 = vmatpush.msrb.mxu0 %v934_v34 }
 0x1bd   : > { %983 = vmatmul.f32.vlgmr.msrb.gmra.mxu2 %v2488_v42  ;;  %1023 = vmatmul.f32.vlgmr.msrb.gmra.mxu3 %v2492_v50 }
 0x1be   : > { %1066 = vmatpush.msrb.mxu0 %v940_v33  ;;  %v936_v39 = vand.u32 4294901760, %v935_v36  ;;  %1148 = vmatpush.msra.mxu2 %v2439_v3 }
 0x1bf   : > { %1187 = vmatpush.msra.mxu3 %v2469_v21 }
 0x1c0   : > { %1282 = vmatpush.msra.mxu0 %v2456_v13  ;;  %937 = vmatpush.msra.mxu1 %v936_v39 }
 0x1c1   : > { %1150 = vmatpush.msra.mxu2 %v2441_v4  ;;  %1193 = vmatpush.msra.mxu3 %v2471_v22 }
 0x1c2   : > { %943 = vmatpush.msra.mxu1 %v942_v40  ;;  %1286 = vmatpush.msra.mxu0 %v2459_v14 }
 0x1c3   : > { %1219 = vmatpush.msrb.mxu2 %v2448_v9  ;;  %1249 = vmatpush.msrb.mxu3 %v2439_v3 }
 0x1c4   : > { %898 = vmatmul.f32.gmra.mxu0 %v2525_v18  ;;  %945 = vmatmul.f32.vlgmr.msra.gmra.mxu1 %v2482_v38 }
 0x1c5   : > { %1099 = vmatpush.msrb.mxu1 %v881_v31  ;;  %1222 = vmatpush.msrb.mxu2 %v2451_v10 }
 0x1c6   : > { %988 = vmatmul.f32.gmra.mxu2 %v2502_v58  ;;  %1029 = vmatmul.f32.gmra.mxu3 %v2508_v0 }
 0x1c7   : > { %1101 = vmatpush.msrb.mxu1 %v883_v17  ;;  %1251 = vmatpush.msrb.mxu3 %v2441_v4 }
 0x1c9   : > { %1311 = vmatpush.msra.mxu1 %v2439_v3 }
 0x1cb   : > { %1313 = vmatpush.msra.mxu1 %v2441_v4 }
 0x1cc   : > { %906 = vmatmul.f32.gmra.mxu0 %v2551_v28  ;;  %949 = vmatmul.f32.gmra.mxu1 %v2494_v51 }
 0x1ce   : > { %993 = vmatmul.f32.gmra.mxu2 %v2519_v11  ;;  %1035 = vmatmul.f32.gmra.mxu3 %v2528_v19 }
 0x1d4   : > { %914 = vmatmul.f32.gmra.mxu0 %v2567_v35  ;;  %953 = vmatmul.f32.gmra.mxu1 %v2510_v1 }
 0x1d6   : > { %998 = vmatmul.f32.gmra.mxu2 %v2543_v25  ;;  %1041 = vmatmul.f32.gmra.mxu3 %v2554_v29 }
 0x1dc   : > { %957 = vmatmul.f32.gmra.mxu1 %v2530_v20  ;;  %1068 = vmatmul.f32.vlgmr.msrb.gmra.mxu0 %v2482_v38 }
 0x1de   : > { %1156 = vmatmul.f32.vlgmr.msra.gmra.mxu2 %v1155_v54  ;;  %1195 = vmatmul.f32.vlgmr.msra.gmra.mxu3 %v1151_v44 }
 0x1e4   : > { %1072 = vmatmul.f32.gmra.mxu0 %v2494_v51  ;;  %1103 = vmatmul.f32.vlgmr.msrb.gmra.mxu1 %v2482_v38 }
 0x1e6   : > { %1164 = vmatmul.f32.gmra.mxu2 %v1163_v57  ;;  %1199 = vmatmul.f32.gmra.mxu3 %v1159_v49 }
 0x1ec   : > { %1076 = vmatmul.f32.gmra.mxu0 %v2510_v1  ;;  %1107 = vmatmul.f32.gmra.mxu1 %v2494_v51 }
 0x1ee   : > { %1225 = vmatmul.f32.vlgmr.msrb.gmra.mxu2 %v1152_v46  ;;  %1255 = vmatmul.f32.vlgmr.msrb.gmra.mxu3 %v1153_v48 }
 0x1f4   : > { %1080 = vmatmul.f32.gmra.mxu0 %v2530_v20  ;;  %1111 = vmatmul.f32.gmra.mxu1 %v2510_v1 }
 0x1f6   : > { %1230 = vmatmul.f32.gmra.mxu2 %v1160_v53  ;;  %1261 = vmatmul.f32.gmra.mxu3 %v1161_v55 }
 0x1fc   : > { %1115 = vmatmul.f32.gmra.mxu1 %v2530_v20  ;;  %1288 = vmatmul.f32.vlgmr.msra.gmra.mxu0 %v1151_v44 }
 0x204   : > { %1292 = vmatmul.f32.gmra.mxu0 %v1159_v49  ;;  %1315 = vmatmul.f32.vlgmr.msra.gmra.mxu1 %v1151_v44 }
 0x20c   : > { %1319 = vmatmul.f32.gmra.mxu1 %v1159_v49 }
 0x238   : > { %v891_v61 = vpop.f32.mrf.mxu0 }
 0x240   : > { %v984_v59 = vpop.f32.mrf.mxu2  ;;  %v1024_v60 = vpop.f32.mrf.mxu3 }
 0x241   : > { %v899_v62 = vpop.f32.mrf.mxu0  ;;  %v946_v6 = vpop.f32.mrf.mxu1 }
 0x242   : > { %v947_v17 = vadd.f32 %v946_v6, %v891_v61 }
 0x244   : > { %v985_v27 = vadd.f32 %v984_v59, %v947_v17 }
 0x246   : > { %v1025_v32 = vadd.f32 %v1024_v60, %v985_v27 }
 0x249   : > { %v907_v5 = vpop.f32.mrf.mxu0  ;;  %v950_v7 = vpop.f32.mrf.mxu1 }
 0x24a   : > { %v989_v12 = vpop.f32.mrf.mxu2  ;;  %v1030_v2 = vpop.f32.mrf.mxu3  ;;  %v951_v33 = vadd.f32 %v950_v7, %v899_v62 }
 0x24c   : > { %v990_v39 = vadd.f32 %v989_v12, %v951_v33 }
 0x24e   : > { %v1031_v44 = vadd.f32 %v1030_v2, %v990_v39 }
 0x251   : > { %v915_v15 = vpop.f32.mrf.mxu0  ;;  %v954_v16 = vpop.f32.mrf.mxu1 }
 0x252   : > { %v994_v23 = vpop.f32.mrf.mxu2  ;;  %v1036_v24 = vpop.f32.mrf.mxu3  ;;  %v955_v45 = vadd.f32 %v954_v16, %v907_v5 }
 0x254   : > { %v995_v49 = vadd.f32 %v994_v23, %v955_v45 }
 0x256   : > { %v1037_v54 = vadd.f32 %v1036_v24, %v995_v49 }
 0x259   : > { %v958_v8 = vpop.f32.mrf.mxu1  ;;  %v1069_v26 = vpop.f32.mrf.mxu0 }
 0x25a   : > { %v999_v30 = vpop.f32.mrf.mxu2  ;;  %v1042_v31 = vpop.f32.mrf.mxu3  ;;  %v1070_v34 = vadd.f32 %v1069_v26, %v1025_v32  ;;  %v959_v55 = vadd.f32 %v958_v8, %v915_v15 }
 0x25c   : > { %v1000_v6 = vadd.f32 %v999_v30, %v959_v55 }
 0x25e   : > { %v1043_v5 = vadd.f32 %v1042_v31, %v1000_v6 }
 0x261   : > { %v1073_v36 = vpop.f32.mrf.mxu0  ;;  %v1104_v37 = vpop.f32.mrf.mxu1 }
 0x262   : > { %v1105_v40 = vadd.f32 %v1104_v37, %v1070_v34  ;;  %v1157_v41 = vpop.f32.mrf.mxu2  ;;  %v1196_v43 = vpop.f32.mrf.mxu3  ;;  %v1074_v46 = vadd.f32 %v1073_v36, %v1031_v44 }
 0x263   : > { %v1197_v7 = vadd.f32 %v1196_v43, %v1157_v41 }
 0x264   : > { %2138 = vst.msk [vmem:[%s2583_s28 + $0x20] sm:$0xff] %vm663_vm1, %v1105_v40 }
 0x269   : > { %v1077_v47 = vpop.f32.mrf.mxu0  ;;  %v1108_v48 = vpop.f32.mrf.mxu1 }
 0x26a   : > { %v1109_v52 = vadd.f32 %v1108_v48, %v1074_v46  ;;  %v1165_v53 = vpop.f32.mrf.mxu2  ;;  %v1200_v56 = vpop.f32.mrf.mxu3  ;;  %v1078_v57 = vadd.f32 %v1077_v47, %v1037_v54  ;;  %v2148_v54 = vld [vmem:[%s2426_s6 + $0x30] sm:$0xff] }
 0x26b   : > { %v1201_v8 = vadd.f32 %v1200_v56, %v1165_v53 }
 0x26c   : > { %2139 = vst.msk [vmem:[%s2583_s28 + $0x28] sm:$0xff] %vm663_vm1, %v1109_v52 }
 0x271   : > { %v1081_v61 = vpop.f32.mrf.mxu0  ;;  %v1112_v62 = vpop.f32.mrf.mxu1 }
 0x272   : > { %v1113_v59 = vadd.f32 %v1112_v62, %v1078_v57  ;;  %v1226_v60 = vpop.f32.mrf.mxu2  ;;  %v1082_v12 = vadd.f32 %v1081_v61, %v1043_v5  ;;  %v1256_v2 = vpop.f32.mrf.mxu3 }
 0x273   : > { %v1227_v23 = vadd.f32 %v1226_v60, %v1197_v7 }
 0x274   : > { %2140 = vst.msk [vmem:[%s2583_s28 + $0x30] sm:$0xff] %vm663_vm1, %v1113_v59 }
 0x275   : > { %v1257_v15 = vadd.f32 %v1256_v2, %v1227_v23 }
 0x279   : > { %v1116_v16 = vpop.f32.mrf.mxu1  ;;  %v1289_v26 = vpop.f32.mrf.mxu0 }
 0x27a   : > { %v1117_v17 = vadd.f32 %v1116_v16, %v1082_v12  ;;  %v1231_v24 = vpop.f32.mrf.mxu2  ;;  %v1290_v27 = vadd.f32 %v1289_v26, %v1257_v15  ;;  %v1262_v34 = vpop.f32.mrf.mxu3 }
 0x27b   : > { %v1232_v30 = vadd.f32 %v1231_v24, %v1201_v8 }
 0x27c   : > { %2141 = vst.msk [vmem:[%s2583_s28 + $0x38] sm:$0xff] %vm663_vm1, %v1117_v17 }
 0x27d   : > { %v1263_v37 = vadd.f32 %v1262_v34, %v1232_v30 }
 0x281   : > { %v1316_v32 = vpop.f32.mrf.mxu1  ;;  %v1293_v36 = vpop.f32.mrf.mxu0 }
 0x282   : > { %v1317_v33 = vadd.f32 %v1316_v32, %v1290_v27  ;;  %v1294_v39 = vadd.f32 %v1293_v36, %v1263_v37 }
 0x284   : > { %v1339_v31 = vand.u32 4294901760, %v1317_v33 }
 0x286   : > { %v1395_v41 = vsub.f32 %v1317_v33, %v1339_v31 }
 0x288   : > { %v1396_v46 = vand.u32 4294901760, %v1395_v41 }
 0x289   : > { %v1320_v40 = vpop.f32.mrf.mxu1 }
 0x28a   : > { %v1321_v43 = vadd.f32 %v1320_v40, %v1294_v39  ;;  %v1397_v49 = vsub.f32 %v1395_v41, %v1396_v46 }
 0x28c   : > { %v1337_v44 = vand.u32 4294901760, %v1321_v43  ;;  %v1398_v53 = vand.u32 4294901760, %v1397_v49 }
 0x28e   : > { %v1389_v45 = vsub.f32 %v1321_v43, %v1337_v44  ;;  %1338 = vmatpush.msra.mxu2 %v1337_v44  ;;  %1473 = vmatpush.msrb.mxu1 %v1337_v44 }
 0x290   : > { %v1390_v47 = vand.u32 4294901760, %v1389_v45  ;;  %1340 = vmatpush.msra.mxu2 %v1339_v31  ;;  %1433 = vmatpush.msrb.mxu0 %v1389_v45 }
 0x291   : > { %1475 = vmatpush.msrb.mxu1 %v1339_v31  ;;  %1346 = vmatmul.f32.vlgmr.msra.gmra.mxu2 %v2505_v63 }
 0x292   : > { %v1391_v48 = vsub.f32 %v1389_v45, %v1390_v47  ;;  %1436 = vmatpush.msrb.mxu0 %v1395_v41  ;;  %1518 = vmatpush.msrb.mxu2 %v1390_v47 }
 0x293   : > { %1439 = vmatmul.f32.vlgmr.msrb.gmra.mxu0 %v2488_v42  ;;  %1479 = vmatmul.f32.vlgmr.msrb.gmra.mxu1 %v2492_v50 }
 0x294   : > { %1522 = vmatpush.msrb.mxu2 %v1396_v46  ;;  %v1392_v52 = vand.u32 4294901760, %v1391_v48  ;;  %1604 = vmatpush.msra.mxu0 %v2439_v3 }
 0x295   : > { %1643 = vmatpush.msra.mxu1 %v2469_v21 }
 0x296   : > { %1738 = vmatpush.msra.mxu2 %v2456_v13  ;;  %1393 = vmatpush.msra.mxu3 %v1392_v52  ;;  %v1584_v13 = vsel %vm202_vm0, %v2148_v54, 0 }
 0x297   : > { %1606 = vmatpush.msra.mxu0 %v2441_v4  ;;  %1649 = vmatpush.msra.mxu1 %v2471_v22 }
 0x298   : > { %1399 = vmatpush.msra.mxu3 %v1398_v53  ;;  %1742 = vmatpush.msra.mxu2 %v2459_v14 }
 0x299   : > { %1675 = vmatpush.msrb.mxu0 %v2448_v9  ;;  %1705 = vmatpush.msrb.mxu1 %v2439_v3  ;;  %v1607_v9 = vand.u32 4294901760, %v1584_v13 }
 0x29a   : > { %1354 = vmatmul.f32.gmra.mxu2 %v2525_v18  ;;  %1401 = vmatmul.f32.vlgmr.msra.gmra.mxu3 %v2482_v38 }
 0x29b   : > { %1555 = vmatpush.msrb.mxu3 %v1337_v44  ;;  %1678 = vmatpush.msrb.mxu0 %v2451_v10  ;;  %v2149_v10 = vld [vmem:[%s2426_s6 + $0x38] sm:$0xff]  ;;  %v1608_v21 = vsub.f32 %v1584_v13, %v1607_v9 }
 0x29c   : > { %1444 = vmatmul.f32.gmra.mxu0 %v2502_v58  ;;  %1485 = vmatmul.f32.gmra.mxu1 %v2508_v0  ;;  %v1587_v22 = vsel %vm202_vm0, %v2149_v10, 0 }
 0x29d   : > { %1557 = vmatpush.msrb.mxu3 %v1339_v31  ;;  %1707 = vmatpush.msrb.mxu1 %v2441_v4  ;;  %v1609_v55 = vand.u32 4294901760, %v1608_v21  ;;  %v1615_v56 = vand.u32 4294901760, %v1587_v22 }
 0x29f   : > { %1767 = vmatpush.msra.mxu3 %v2439_v3  ;;  %v1610_v3 = vsub.f32 %v1608_v21, %v1609_v55 }
 0x2a1   : > { %1769 = vmatpush.msra.mxu3 %v2441_v4  ;;  %v1616_v4 = vsub.f32 %v1587_v22, %v1615_v56  ;;  %v1611_v14 = vand.u32 4294901760, %v1610_v3 }
 0x2a2   : > { %1362 = vmatmul.f32.gmra.mxu2 %v2551_v28  ;;  %1405 = vmatmul.f32.gmra.mxu3 %v2494_v51 }
 0x2a3   : > { %v1617_v57 = vand.u32 4294901760, %v1616_v4 }
 0x2a4   : > { %1449 = vmatmul.f32.gmra.mxu0 %v2519_v11  ;;  %1491 = vmatmul.f32.gmra.mxu1 %v2528_v19 }
 0x2a5   : > { %v1618_v61 = vsub.f32 %v1616_v4, %v1617_v57 }
 0x2a7   : > { %v1619_v62 = vand.u32 4294901760, %v1618_v61 }
 0x2aa   : > { %1370 = vmatmul.f32.gmra.mxu2 %v2567_v35  ;;  %1409 = vmatmul.f32.gmra.mxu3 %v2510_v1 }
 0x2ac   : > { %1454 = vmatmul.f32.gmra.mxu0 %v2543_v25  ;;  %1497 = vmatmul.f32.gmra.mxu1 %v2554_v29 }
 0x2b2   : > { %1413 = vmatmul.f32.gmra.mxu3 %v2530_v20  ;;  %1524 = vmatmul.f32.vlgmr.msrb.gmra.mxu2 %v2482_v38 }
 0x2b4   : > { %1612 = vmatmul.f32.vlgmr.msra.gmra.mxu0 %v1611_v14  ;;  %1651 = vmatmul.f32.vlgmr.msra.gmra.mxu1 %v1607_v9 }
 0x2ba   : > { %1528 = vmatmul.f32.gmra.mxu2 %v2494_v51  ;;  %1559 = vmatmul.f32.vlgmr.msrb.gmra.mxu3 %v2482_v38 }
 0x2bc   : > { %1620 = vmatmul.f32.gmra.mxu0 %v1619_v62  ;;  %1655 = vmatmul.f32.gmra.mxu1 %v1615_v56 }
 0x2c2   : > { %1532 = vmatmul.f32.gmra.mxu2 %v2510_v1  ;;  %1563 = vmatmul.f32.gmra.mxu3 %v2494_v51 }
 0x2c4   : > { %1681 = vmatmul.f32.vlgmr.msrb.gmra.mxu0 %v1608_v21  ;;  %1711 = vmatmul.f32.vlgmr.msrb.gmra.mxu1 %v1609_v55 }
 0x2ca   : > { %1536 = vmatmul.f32.gmra.mxu2 %v2530_v20  ;;  %1567 = vmatmul.f32.gmra.mxu3 %v2510_v1 }
 0x2cc   : > { %1686 = vmatmul.f32.gmra.mxu0 %v1616_v4  ;;  %1717 = vmatmul.f32.gmra.mxu1 %v1617_v57 }
 0x2d2   : > { %1571 = vmatmul.f32.gmra.mxu3 %v2530_v20  ;;  %1744 = vmatmul.f32.vlgmr.msra.gmra.mxu2 %v1607_v9 }
 0x2da   : > { %1748 = vmatmul.f32.gmra.mxu2 %v1615_v56  ;;  %1771 = vmatmul.f32.vlgmr.msra.gmra.mxu3 %v1607_v9 }
 0x2e2   : > { %1775 = vmatmul.f32.gmra.mxu3 %v1615_v56 }
 0x310   : > { %v1440_v6 = vpop.f32.mrf.mxu0  ;;  %v1480_v60 = vpop.f32.mrf.mxu1 }
 0x314   : > { %v1347_v59 = vpop.f32.mrf.mxu2 }
 0x319   : > { %v1445_v12 = vpop.f32.mrf.mxu0  ;;  %v1486_v2 = vpop.f32.mrf.mxu1 }
 0x31d   : > { %v1355_v5 = vpop.f32.mrf.mxu2  ;;  %v1402_v7 = vpop.f32.mrf.mxu3 }
 0x31e   : > { %v1403_v8 = vadd.f32 %v1402_v7, %v1347_v59 }
 0x320   : > { %v1441_v33 = vadd.f32 %v1440_v6, %v1403_v8 }
 0x321   : > { %v1450_v17 = vpop.f32.mrf.mxu0  ;;  %v1492_v26 = vpop.f32.mrf.mxu1 }
 0x322   : > { %v1481_v37 = vadd.f32 %v1480_v60, %v1441_v33 }
 0x325   : > { %v1363_v16 = vpop.f32.mrf.mxu2  ;;  %v1406_v23 = vpop.f32.mrf.mxu3 }
 0x326   : > { %v1407_v36 = vadd.f32 %v1406_v23, %v1355_v5 }
 0x328   : > { %v1446_v43 = vadd.f32 %v1445_v12, %v1407_v36 }
 0x329   : > { %v1455_v27 = vpop.f32.mrf.mxu0  ;;  %v1498_v34 = vpop.f32.mrf.mxu1 }
 0x32a   : > { %v1487_v47 = vadd.f32 %v1486_v2, %v1446_v43 }
 0x32d   : > { %v1371_v15 = vpop.f32.mrf.mxu2  ;;  %v1410_v24 = vpop.f32.mrf.mxu3 }
 0x32e   : > { %v1411_v46 = vadd.f32 %v1410_v24, %v1363_v16 }
 0x330   : > { %v1451_v53 = vadd.f32 %v1450_v17, %v1411_v46 }
 0x331   : > { %v1613_v39 = vpop.f32.mrf.mxu0  ;;  %v1652_v45 = vpop.f32.mrf.mxu1 }
 0x332   : > { %v1493_v10 = vadd.f32 %v1492_v26, %v1451_v53  ;;  %v1653_v57 = vadd.f32 %v1652_v45, %v1613_v39 }
 0x335   : > { %v1414_v32 = vpop.f32.mrf.mxu3  ;;  %v1525_v30 = vpop.f32.mrf.mxu2 }
 0x336   : > { %v1526_v31 = vadd.f32 %v1525_v30, %v1481_v37  ;;  %v1415_v9 = vadd.f32 %v1414_v32, %v1371_v15 }
 0x338   : > { %v1456_v3 = vadd.f32 %v1455_v27, %v1415_v9 }
 0x339   : > { %v1621_v13 = vpop.f32.mrf.mxu0  ;;  %v1656_v21 = vpop.f32.mrf.mxu1 }
 0x33a   : > { %v1499_v61 = vadd.f32 %v1498_v34, %v1456_v3  ;;  %v1657_v12 = vadd.f32 %v1656_v21, %v1621_v13 }
 0x33d   : > { %v1529_v40 = vpop.f32.mrf.mxu2  ;;  %v1560_v41 = vpop.f32.mrf.mxu3 }
 0x33e   : > { %v1561_v44 = vadd.f32 %v1560_v41, %v1526_v31  ;;  %v1530_v48 = vadd.f32 %v1529_v40, %v1487_v47 }
 0x340   : > { %2144 = vst.msk [vmem:[%s2583_s28 + $0x40] sm:$0xff] %vm663_vm1, %v1561_v44 }
 0x341   : > { %v1682_v14 = vpop.f32.mrf.mxu0  ;;  %v1712_v6 = vpop.f32.mrf.mxu1 }
 0x342   : > { %v1683_v60 = vadd.f32 %v1682_v14, %v1653_v57 }
 0x344   : > { %v1713_v2 = vadd.f32 %v1712_v6, %v1683_v60 }
 0x345   : > { %v1533_v49 = vpop.f32.mrf.mxu2  ;;  %v1564_v52 = vpop.f32.mrf.mxu3 }
 0x346   : > { %v1565_v54 = vadd.f32 %v1564_v52, %v1530_v48  ;;  %v1534_v22 = vadd.f32 %v1533_v49, %v1493_v10 }
 0x348   : > { %2145 = vst.msk [vmem:[%s2583_s28 + $0x48] sm:$0xff] %vm663_vm1, %v1565_v54 }
 0x349   : > { %v1687_v16 = vpop.f32.mrf.mxu0  ;;  %v1718_v24 = vpop.f32.mrf.mxu1 }
 0x34a   : > { %v1688_v26 = vadd.f32 %v1687_v16, %v1657_v12 }
 0x34c   : > { %v1719_v27 = vadd.f32 %v1718_v24, %v1688_v26 }
 0x34d   : > { %v1537_v55 = vpop.f32.mrf.mxu2  ;;  %v1568_v56 = vpop.f32.mrf.mxu3 }
 0x34e   : > { %v1569_v4 = vadd.f32 %v1568_v56, %v1534_v22  ;;  %v1538_v62 = vadd.f32 %v1537_v55, %v1499_v61 }
 0x350   : > { %2146 = vst.msk [vmem:[%s2583_s28 + $0x50] sm:$0xff] %vm663_vm1, %v1569_v4 }
 0x355   : > { %v1572_v59 = vpop.f32.mrf.mxu3  ;;  %v1745_v7 = vpop.f32.mrf.mxu2 }
 0x356   : > { %v1573_v5 = vadd.f32 %v1572_v59, %v1538_v62  ;;  %v1746_v23 = vadd.f32 %v1745_v7, %v1713_v2 }
 0x358   : > { %2147 = vst.msk [vmem:[%s2583_s28 + $0x58] sm:$0xff] %vm663_vm1, %v1573_v5 }
 0x35d   : > { %v1772_v17 = vpop.f32.mrf.mxu3  ;;  %v1749_v8 = vpop.f32.mrf.mxu2 }
 0x35e   : > { %v1773_v15 = vadd.f32 %v1772_v17, %v1746_v23  ;;  %v1750_v30 = vadd.f32 %v1749_v8, %v1719_v27 }
 0x360   : > { %v1795_v32 = vand.u32 4294901760, %v1773_v15 }
 0x362   : > { %v1851_v34 = vsub.f32 %v1773_v15, %v1795_v32 }
 0x364   : > { %v1852_v39 = vand.u32 4294901760, %v1851_v34 }
 0x365   : > { %v1776_v33 = vpop.f32.mrf.mxu3 }
 0x366   : > { %v1777_v36 = vadd.f32 %v1776_v33, %v1750_v30  ;;  %v1853_v43 = vsub.f32 %v1851_v34, %v1852_v39 }
 0x368   : > { %v1793_v37 = vand.u32 4294901760, %v1777_v36  ;;  %v1854_v45 = vand.u32 4294901760, %v1853_v43 }
 0x36a   : > { %v1845_v31 = vsub.f32 %v1777_v36, %v1793_v37  ;;  %1794 = vmatpush.msra.mxu0 %v1793_v37  ;;  %1929 = vmatpush.msrb.mxu3 %v1793_v37 }
 0x36c   : > { %v1846_v40 = vand.u32 4294901760, %v1845_v31  ;;  %1796 = vmatpush.msra.mxu0 %v1795_v32  ;;  %1889 = vmatpush.msrb.mxu2 %v1845_v31 }
 0x36d   : > { %1931 = vmatpush.msrb.mxu3 %v1795_v32  ;;  %1802 = vmatmul.f32.vlgmr.msra.gmra.mxu0 %v2505_v63 }
 0x36e   : > { %v1847_v41 = vsub.f32 %v1845_v31, %v1846_v40  ;;  %1892 = vmatpush.msrb.mxu2 %v1851_v34  ;;  %1974 = vmatpush.msrb.mxu0 %v1846_v40 }
 0x36f   : > { %1895 = vmatmul.f32.vlgmr.msrb.gmra.mxu2 %v2488_v42  ;;  %1935 = vmatmul.f32.vlgmr.msrb.gmra.mxu3 %v2492_v50 }
 0x370   : > { %1978 = vmatpush.msrb.mxu0 %v1852_v39  ;;  %v1848_v44 = vand.u32 4294901760, %v1847_v41 }
 0x372   : > { %1849 = vmatpush.msra.mxu1 %v1848_v44 }
 0x374   : > { %1855 = vmatpush.msra.mxu1 %v1854_v45 }
 0x375   : > { %1810 = vmatmul.f32.gmra.mxu0 %v2525_v18  ;;  %1857 = vmatmul.f32.vlgmr.msra.gmra.mxu1 %v2482_v38 }
 0x376   : > { %2011 = vmatpush.msrb.mxu1 %v1793_v37 }
 0x377   : > { %1900 = vmatmul.f32.gmra.mxu2 %v2502_v58  ;;  %1941 = vmatmul.f32.gmra.mxu3 %v2508_v0 }
 0x378   : > { %2013 = vmatpush.msrb.mxu1 %v1795_v32 }
 0x37d   : > { %1818 = vmatmul.f32.gmra.mxu0 %v2551_v28  ;;  %1861 = vmatmul.f32.gmra.mxu1 %v2494_v51 }
 0x37f   : > { %1905 = vmatmul.f32.gmra.mxu2 %v2519_v11  ;;  %1947 = vmatmul.f32.gmra.mxu3 %v2528_v19 }
 0x385   : > { %1826 = vmatmul.f32.gmra.mxu0 %v2567_v35  ;;  %1865 = vmatmul.f32.gmra.mxu1 %v2510_v1 }
 0x387   : > { %1910 = vmatmul.f32.gmra.mxu2 %v2543_v25  ;;  %1953 = vmatmul.f32.gmra.mxu3 %v2554_v29 }
 0x38d   : > { %1869 = vmatmul.f32.gmra.mxu1 %v2530_v20  ;;  %1980 = vmatmul.f32.vlgmr.msrb.gmra.mxu0 %v2482_v38 }
 0x395   : > { %1984 = vmatmul.f32.gmra.mxu0 %v2494_v51  ;;  %2015 = vmatmul.f32.vlgmr.msrb.gmra.mxu1 %v2482_v38 }
 0x39d   : > { %1988 = vmatmul.f32.gmra.mxu0 %v2510_v1  ;;  %2019 = vmatmul.f32.gmra.mxu1 %v2494_v51 }
 0x3a5   : > { %1992 = vmatmul.f32.gmra.mxu0 %v2530_v20  ;;  %2023 = vmatmul.f32.gmra.mxu1 %v2510_v1 }
 0x3ad   : > { %2027 = vmatmul.f32.gmra.mxu1 %v2530_v20 }
 0x3ea   : > { %v1803_v42 = vpop.f32.mrf.mxu0 }
 0x3f2   : > { %v1811_v50 = vpop.f32.mrf.mxu0  ;;  %v1858_v58 = vpop.f32.mrf.mxu1 }
 0x3f3   : > { %v1896_v11 = vpop.f32.mrf.mxu2  ;;  %v1936_v38 = vpop.f32.mrf.mxu3  ;;  %v1859_v25 = vadd.f32 %v1858_v58, %v1803_v42 }
 0x3f5   : > { %v1897_v51 = vadd.f32 %v1896_v11, %v1859_v25 }
 0x3f7   : > { %v1937_v47 = vadd.f32 %v1936_v38, %v1897_v51 }
 0x3fa   : > { %v1819_v63 = vpop.f32.mrf.mxu0  ;;  %v1862_v0 = vpop.f32.mrf.mxu1 }
 0x3fb   : > { %v1901_v35 = vpop.f32.mrf.mxu2  ;;  %v1863_v46 = vadd.f32 %v1862_v0, %v1811_v50  ;;  %v1942_v1 = vpop.f32.mrf.mxu3 }
 0x3fd   : > { %v1902_v52 = vadd.f32 %v1901_v35, %v1863_v46 }
 0x3ff   : > { %v1943_v9 = vadd.f32 %v1942_v1, %v1902_v52 }
 0x402   : > { %v1827_v18 = vpop.f32.mrf.mxu0  ;;  %v1866_v19 = vpop.f32.mrf.mxu1 }
 0x403   : > { %v1906_v54 = vpop.f32.mrf.mxu2  ;;  %v1867_v13 = vadd.f32 %v1866_v19, %v1819_v63  ;;  %v1948_v21 = vpop.f32.mrf.mxu3 }
 0x405   : > { %v1907_v55 = vadd.f32 %v1906_v54, %v1867_v13 }
 0x407   : > { %v1949_v14 = vadd.f32 %v1948_v21, %v1907_v55 }
 0x40a   : > { %v1870_v28 = vpop.f32.mrf.mxu1  ;;  %v1981_v29 = vpop.f32.mrf.mxu0 }
 0x40b   : > { %v1982_v20 = vadd.f32 %v1981_v29, %v1937_v47  ;;  %v1871_v4 = vadd.f32 %v1870_v28, %v1827_v18  ;;  %v1911_v57 = vpop.f32.mrf.mxu2  ;;  %v1954_v60 = vpop.f32.mrf.mxu3 }
 0x40d   : > { %v1912_v6 = vadd.f32 %v1911_v57, %v1871_v4 }
 0x40f   : > { %v1955_v7 = vadd.f32 %v1954_v60, %v1912_v6 }
 0x412   : > { %v1985_v48 = vpop.f32.mrf.mxu0  ;;  %v2016_v49 = vpop.f32.mrf.mxu1 }
 0x413   : > { %v2017_v53 = vadd.f32 %v2016_v49, %v1982_v20  ;;  %v1986_v10 = vadd.f32 %v1985_v48, %v1943_v9 }
 0x415   : > { %2150 = vst.msk [vmem:[%s2583_s28 + $0x60] sm:$0xff] %vm663_vm1, %v2017_v53 }
 0x41a   : > { %v2020_v22 = vpop.f32.mrf.mxu1  ;;  %v1989_v3 = vpop.f32.mrf.mxu0 }
 0x41b   : > { %v2021_v56 = vadd.f32 %v2020_v22, %v1986_v10  ;;  %v1990_v61 = vadd.f32 %v1989_v3, %v1949_v14 }
 0x41d   : > { %2151 = vst.msk [vmem:[%s2583_s28 + $0x68] sm:$0xff] %vm663_vm1, %v2021_v56 }
 0x422   : > { %v2024_v62 = vpop.f32.mrf.mxu1  ;;  %v1993_v5 = vpop.f32.mrf.mxu0 }
 0x423   : > { %v2025_v59 = vadd.f32 %v2024_v62, %v1990_v61  ;;  %v1994_v12 = vadd.f32 %v1993_v5, %v1955_v7 }
 0x425   : > { %2152 = vst.msk [vmem:[%s2583_s28 + $0x70] sm:$0xff] %vm663_vm1, %v2025_v59 }
 0x42a   : > { %v2028_v2 = vpop.f32.mrf.mxu1 }
 0x42b   : > { %v2029_v16 = vadd.f32 %v2028_v2, %v1994_v12 }
 0x42d   : > { %2153 = vst.msk [vmem:[%s2583_s28 + $0x78] sm:$0xff] %vm663_vm1, %v2029_v16 }
 0x42e   : > { %2271 = shalt.err (!%p2268_p4)
}
 0x42f   : > { %s2314_s29 = smov 128   ;;  %s2315_s22 = smov 8  }
 0x430   : > { %2166 = dma.vmem_to_hbm [thread:$0]  (%p2386_p11), %s2051_s7, 2048, %s2053_s8, %s2037_s16, %s2314_s29, %s2314_s29, %s2315_s22  }
 0x431 PF: > { %s2067_s27 = sand.u32 1, %s2298_s12   ;;  %p2764_p7 = scmp.ge.s32.totalorder %s2310_s15, 2 }
 0x432   : > { %s2068_s26 = scalar_lea.sflag [#allocation4], %s2067_s27 }
 0x433   : > { %p2173_p5 = pnand %p2764_p7, %p2390_p12 }
 0x435   : > { %p2174_p8 = pneg %p2173_p5 }
 0x437   : > { %2293 = dma.done.wait (%p2174_p8), %s2068_s26, 2048  }
 0x438   : > { %2295 = vsyncadd (%p2174_p8), %s2068_s26, 4294965248  ;;  %p16_p10 = scmp.ge.s32.totalorder %s2361_s18, 4   ;;  %s2765_s12 = smov %s2302_s13 }
 0x439   : > { %s2766_s13 = smov %s2306_s14  ;;  %s2767_s14 = smov %s2373_s21 }
 0x43a   : > { %s2768_s15 = smov %s2361_s18  ;;  %18 = sbr.rel (!%p16_p10) target bundleno = 5 (0x5), region = 83 }
 0x43f   :  { %2074 = vsyncpa [#allocation3], 1 }
 0x440   :  { %2076 = vsyncpa [#allocation3 + $0x1], 1 }
 0x441   :  { %2077 = vsyncpa [#allocation4], 1 }
 0x442   :  { %2079 = vsyncpa [#allocation4 + $0x1], 1 }

</bundles_post_ra>
